<compile_context>
chip_gen: v7x
topology: tpu7x:2x2x1
jax: 0.10.0
libtpu: 0.0.40
codegen_flags: <defaults>
</compile_context>

<pallas_src>
import functools

import jax
import jax.numpy as jnp
from jax.experimental import pallas as pl
from jax.experimental.pallas import tpu as pltpu


def _round_up(x, m):
    return (x + m - 1) // m * m


def _conv_bn_kernel(x_ref, w_ref, bias_ref, o_ref, *, rows, Wo, KH, KW, dil, Cin):
    """One (batch, output-row-block) tile per grid step.

    x_ref:    (1, Hp, Wp, Cin)        zero-padded NHWC image (resident per batch)
    w_ref:    (KH*KW*Cin, Cout_pad)   BN-scale-folded weights, (kh, kw, cin)-major
    bias_ref: (1, Cout_pad)           folded BN bias (f32)
    o_ref:    (1, rows*Wo, Cout_pad)  lane-dense output slab for this row block
    """
    r0 = pl.multiple_of(pl.program_id(1) * rows, rows)   # first output row of block

    # Single dynamic-offset load: the full receptive-field row slab for this block.
    slab = x_ref[0, pl.ds(r0, rows + (KH - 1) * dil), :, :]   # (rows+(KH-1)*dil, Wp, Cin)

    # Build the im2col slab with static slices of the loaded array.
    # Lane order must match weight row order: kh-major, kw-middle, cin-minor.
    cols = []
    for kh in range(KH):
        rows_kh = slab[kh * dil:kh * dil + rows]               # (rows, Wp, Cin)
        for kw in range(KW):
            cols.append(rows_kh[:, kw * dil:kw * dil + Wo, :])  # (rows, Wo, Cin)
    lhs = jnp.concatenate(cols, axis=-1).reshape(rows * Wo, KH * KW * Cin)

    # One MXU contraction over KH*KW*Cin; f32 accumulation, native-dtype operands.
    acc = jnp.dot(lhs, w_ref[...], preferred_element_type=jnp.float32)

    # Epilogue: fused BatchNorm bias only (scale already folded into weights).
    o_ref[0] = (acc + bias_ref[...]).astype(o_ref.dtype)


def _pick_rows_per_block(Ho, Wo, cout_pad, itemsize, target_bytes=1 << 20):
    """Largest divisor of Ho whose output block fits `target_bytes` and keeps the
    sublane dim (rows*Wo) 8-aligned (or covers the full extent)."""
    best = None
    for d in range(1, Ho + 1):
        if Ho % d:
            continue
        if (d * Wo) % 8 != 0 and d != Ho:
            continue
        if d * Wo * cout_pad * itemsize <= target_bytes:
            best = d
    return best if best is not None else Ho


def basic_conv2d(x_nchw, weight_oihw, gamma, beta, running_mean, running_var,
                 *, stride=1, padding=0, dilation=1, eps=1e-5, rows_per_block=None):
    assert stride == 1, "only stride=1 is implemented for this instance"
    N, Cin, H, W = x_nchw.shape
    Cout, Cin_w, KH, KW = weight_oihw.shape
    assert Cin == Cin_w

    Ho = (H + 2 * padding - dilation * (KH - 1) - 1) // stride + 1
    Wo = (W + 2 * padding - dilation * (KW - 1) - 1) // stride + 1

    # ---- plain-JAX glue: layout, padding, weight repack + BN folding ----
    x_nhwc = jnp.transpose(x_nchw, (0, 2, 3, 1))
    x_pad = jnp.pad(x_nhwc, ((0, 0), (padding, padding), (padding, padding), (0, 0)))
    Hp, Wp = x_pad.shape[1], x_pad.shape[2]
    itemsize = x_pad.dtype.itemsize

    # Lane-dense output channels: pad Cout to a multiple of 128.  Padded columns
    # carry zero weights/bias, so they never contaminate the real outputs.
    Cout_pad = _round_up(Cout, 128)

    scale = (gamma / jnp.sqrt(running_var + eps)).astype(jnp.float32)
    bias = (beta - running_mean * scale).astype(jnp.float32)

    # Fold BN scale into weights, repack OIHW -> (KH*KW*Cin, Cout_pad), keep the
    # operand dtype equal to the activation dtype (bf16 stays bf16).
    w = weight_oihw.astype(jnp.float32) * scale[:, None, None, None]
    w = jnp.transpose(w, (2, 3, 1, 0)).reshape(KH * KW * Cin, Cout)   # (kh,kw,cin)-major
    w = jnp.pad(w, ((0, 0), (0, Cout_pad - Cout))).astype(x_nchw.dtype)
    bias_pad = jnp.pad(bias, (0, Cout_pad - Cout)).reshape(1, Cout_pad)

    if rows_per_block is None:
        rows_per_block = _pick_rows_per_block(Ho, Wo, Cout_pad, itemsize)
    assert Ho % rows_per_block == 0
    assert (rows_per_block * Wo) % 8 == 0 or rows_per_block == Ho
    R = Ho // rows_per_block

    kernel = functools.partial(
        _conv_bn_kernel,
        rows=rows_per_block, Wo=Wo, KH=KH, KW=KW, dil=dilation, Cin=Cin,
    )

    # ---- VMEM budget (padded-layout aware), clamped so it is safe on v7x ----
    in_block = Hp * _round_up(Wp, 8) * _round_up(Cin, 128) * itemsize
    out_block = _round_up(rows_per_block * Wo, 8) * Cout_pad * itemsize
    w_bytes = _round_up(KH * KW * Cin, 8) * Cout_pad * itemsize
    bias_bytes = 8 * Cout_pad * 4
    lhs_bytes = _round_up(rows_per_block * Wo, 8) * _round_up(KH * KW * Cin, 128) * itemsize
    est = 2 * (in_block + out_block + w_bytes + bias_bytes + lhs_bytes)
    vmem_limit = int(min(max(2 * est, 32 * 2**20), 64 * 2**20))

    flops = 2 * N * Ho * Wo * KH * KW * Cin * Cout
    bytes_accessed = (x_pad.size * itemsize + w.size * w.dtype.itemsize
                      + N * Ho * Wo * Cout_pad * itemsize)

    out = pl.pallas_call(
        kernel,
        out_shape=jax.ShapeDtypeStruct((N, Ho * Wo, Cout_pad), x_nchw.dtype),
        grid=(N, R),
        in_specs=[
            # Full padded image per batch element; block index is constant along
            # the row axis, so it is DMA'd once per image and reused.
            pl.BlockSpec((1, Hp, Wp, Cin), lambda n, r: (n, 0, 0, 0)),
            # Weights / bias: constant block index -> never re-DMA'd.
            pl.BlockSpec((KH * KW * Cin, Cout_pad), lambda n, r: (0, 0)),
            pl.BlockSpec((1, Cout_pad), lambda n, r: (0, 0)),
        ],
        out_specs=pl.BlockSpec((1, rows_per_block * Wo, Cout_pad),
                               lambda n, r: (n, r, 0)),
        compiler_params=pltpu.CompilerParams(
            dimension_semantics=("parallel", "parallel"),
            vmem_limit_bytes=vmem_limit,
        ),
        cost_estimate=pl.CostEstimate(
            flops=flops, transcendentals=0, bytes_accessed=bytes_accessed),
    )(x_pad, w, bias_pad)

    out = out[:, :, :Cout].reshape(N, Ho, Wo, Cout)
    return jnp.transpose(out, (0, 3, 1, 2))    # back to NCHW


def _reference(x_nchw, weight_oihw, gamma, beta, mean, var, *, padding, dilation, eps=1e-5):
    y = jax.lax.conv_general_dilated(
        x_nchw.astype(jnp.float32), weight_oihw.astype(jnp.float32),
        window_strides=(1, 1),
        padding=((padding, padding), (padding, padding)),
        rhs_dilation=(dilation, dilation),
        dimension_numbers=("NCHW", "OIHW", "NCHW"),
    )
    s = (gamma / jnp.sqrt(var + eps))[None, :, None, None]
    b = (beta - mean * gamma / jnp.sqrt(var + eps))[None, :, None, None]
    return y * s + b


if __name__ == "__main__":
    # Small shapes consistent with BasicConv2d(in_planes=4, out_planes=8,
    # kernel_size=3, stride=1, padding=1, dilation=1)
    N, Cin, H, W = 2, 4, 16, 16
    Cout, K = 8, 3
    padding, dilation = 1, 1

    key = jax.random.PRNGKey(0)
    kx, kw, kg, kb, km, kv = jax.random.split(key, 6)

    x = jax.random.normal(kx, (N, Cin, H, W), dtype=jnp.float32)
    weight = jax.random.normal(kw, (Cout, Cin, K, K), dtype=jnp.float32) * 0.1
    gamma = jax.random.normal(kg, (Cout,), dtype=jnp.float32) * 0.1 + 1.0
    beta = jax.random.normal(kb, (Cout,), dtype=jnp.float32) * 0.1
    running_mean = jax.random.normal(km, (Cout,), dtype=jnp.float32) * 0.1
    running_var = jax.random.uniform(kv, (Cout,), dtype=jnp.float32,
                                     minval=0.5, maxval=1.5)

    ref = _reference(x, weight, gamma, beta, running_mean, running_var,
                     padding=padding, dilation=dilation)

    # 1) explicit row tiling (2 row blocks -> exercises the dynamic-offset path)
    out_tiled = basic_conv2d(x, weight, gamma, beta, running_mean, running_var,
                             stride=1, padding=padding, dilation=dilation,
                             rows_per_block=8)
    out_tiled = jax.block_until_ready(out_tiled)
    assert out_tiled.shape == (N, Cout, H, W), out_tiled.shape
    assert jnp.allclose(out_tiled, ref, atol=1e-4, rtol=1e-4), \
        f"max abs err (tiled) = {jnp.max(jnp.abs(out_tiled - ref))}"

    # 2) auto-picked row block
    out_auto = basic_conv2d(x, weight, gamma, beta, running_mean, running_var,
                            stride=1, padding=padding, dilation=dilation)
    out_auto = jax.block_until_ready(out_auto)
    assert jnp.allclose(out_auto, ref, atol=1e-4, rtol=1e-4), \
        f"max abs err (auto) = {jnp.max(jnp.abs(out_auto - ref))}"

    print("KERNEL_OK")
</pallas_src>

<mosaic_0001>
module attributes {stable_mosaic.version = 11 : i64} {
  func.func @_conv_bn_kernel(%arg0: i32, %arg1: i32, %arg2: memref<1x18x18x4xf32, #tpu.memory_space<vmem>>, %arg3: memref<36x128xf32, #tpu.memory_space<vmem>>, %arg4: memref<1x128xf32, #tpu.memory_space<vmem>>, %arg5: memref<1x128x128xf32, #tpu.memory_space<vmem>>) attributes {dimension_semantics = [#tpu.dimension_semantics<parallel>, #tpu.dimension_semantics<parallel>], iteration_bounds = array<i64: 2, 2>, scalar_prefetch = 0 : i64, scratch_operands = 0 : i64, tpu.core_type = #tpu.core_type<tc>, window_params = [{transform_indices = @transform_0, window_bounds = array<i64: 1, 18, 18, 4>}, {pipeline_mode = #tpu.pipeline_mode<synchronous>, transform_indices = @transform_1, window_bounds = array<i64: 36, 128>}, {pipeline_mode = #tpu.pipeline_mode<synchronous>, transform_indices = @transform_2, window_bounds = array<i64: 1, 128>}, {transform_indices = @transform_3, window_bounds = array<i64: 1, 128, 128>}]} {
    %c8_i32 = arith.constant 8 : i32
    %0 = arith.muli %arg1, %c8_i32 : i32
    %1 = tpu.assume_multiple %0, 8 : i32
    %c0 = arith.constant 0 : index
    %2 = arith.index_cast %1 : i32 to index
    %c0_0 = arith.constant 0 : index
    %c0_1 = arith.constant 0 : index
    %3 = vector.load %arg2[%c0, %2, %c0_0, %c0_1] : memref<1x18x18x4xf32, #tpu.memory_space<vmem>>, vector<1x10x18x4xf32>
    %4 = vector.shape_cast %3 : vector<1x10x18x4xf32> to vector<10x18x4xf32>
    %5 = vector.extract_strided_slice %4 {offsets = [0, 0, 0], sizes = [8, 18, 4], strides = [1, 1, 1]} : vector<10x18x4xf32> to vector<8x18x4xf32>
    %6 = vector.extract_strided_slice %5 {offsets = [0, 0, 0], sizes = [8, 16, 4], strides = [1, 1, 1]} : vector<8x18x4xf32> to vector<8x16x4xf32>
    %7 = vector.extract_strided_slice %5 {offsets = [0, 1, 0], sizes = [8, 16, 4], strides = [1, 1, 1]} : vector<8x18x4xf32> to vector<8x16x4xf32>
    %8 = vector.extract_strided_slice %5 {offsets = [0, 2, 0], sizes = [8, 16, 4], strides = [1, 1, 1]} : vector<8x18x4xf32> to vector<8x16x4xf32>
    %9 = vector.extract_strided_slice %4 {offsets = [1, 0, 0], sizes = [8, 18, 4], strides = [1, 1, 1]} : vector<10x18x4xf32> to vector<8x18x4xf32>
    %10 = vector.extract_strided_slice %9 {offsets = [0, 0, 0], sizes = [8, 16, 4], strides = [1, 1, 1]} : vector<8x18x4xf32> to vector<8x16x4xf32>
    %11 = vector.extract_strided_slice %9 {offsets = [0, 1, 0], sizes = [8, 16, 4], strides = [1, 1, 1]} : vector<8x18x4xf32> to vector<8x16x4xf32>
    %12 = vector.extract_strided_slice %9 {offsets = [0, 2, 0], sizes = [8, 16, 4], strides = [1, 1, 1]} : vector<8x18x4xf32> to vector<8x16x4xf32>
    %13 = vector.extract_strided_slice %4 {offsets = [2, 0, 0], sizes = [8, 18, 4], strides = [1, 1, 1]} : vector<10x18x4xf32> to vector<8x18x4xf32>
    %14 = vector.extract_strided_slice %13 {offsets = [0, 0, 0], sizes = [8, 16, 4], strides = [1, 1, 1]} : vector<8x18x4xf32> to vector<8x16x4xf32>
    %15 = vector.extract_strided_slice %13 {offsets = [0, 1, 0], sizes = [8, 16, 4], strides = [1, 1, 1]} : vector<8x18x4xf32> to vector<8x16x4xf32>
    %16 = vector.extract_strided_slice %13 {offsets = [0, 2, 0], sizes = [8, 16, 4], strides = [1, 1, 1]} : vector<8x18x4xf32> to vector<8x16x4xf32>
    %17 = tpu.concatenate %6, %7, %8, %10, %11, %12, %14, %15, %16 in 2 : vector<8x16x4xf32>, vector<8x16x4xf32>, vector<8x16x4xf32>, vector<8x16x4xf32>, vector<8x16x4xf32>, vector<8x16x4xf32>, vector<8x16x4xf32>, vector<8x16x4xf32>, vector<8x16x4xf32> -> vector<8x16x36xf32>
    %18 = vector.shape_cast %17 : vector<8x16x36xf32> to vector<128x36xf32>
    %c0_2 = arith.constant 0 : index
    %c0_3 = arith.constant 0 : index
    %19 = vector.load %arg3[%c0_2, %c0_3] : memref<36x128xf32, #tpu.memory_space<vmem>>, vector<36x128xf32>
    %cst = arith.constant dense<0.000000e+00> : vector<128x128xf32>
    %20 = tpu.matmul %18, %19, %cst {dimension_numbers = #tpu.dot_dimension_numbers<[1], [0], [0], [1], [0, 0, 1, 1], [], []>} : vector<128x36xf32>, vector<36x128xf32>, vector<128x128xf32> -> vector<128x128xf32>
    %c0_4 = arith.constant 0 : index
    %c0_5 = arith.constant 0 : index
    %21 = vector.load %arg4[%c0_4, %c0_5] : memref<1x128xf32, #tpu.memory_space<vmem>>, vector<1x128xf32>
    %22 = vector.broadcast %21 : vector<1x128xf32> to vector<128x128xf32>
    %23 = arith.addf %20, %22 : vector<128x128xf32>
    %c0_6 = arith.constant 0 : index
    %c0_7 = arith.constant 0 : index
    %c0_8 = arith.constant 0 : index
    %24 = vector.load %arg5[%c0_6, %c0_7, %c0_8] : memref<1x128x128xf32, #tpu.memory_space<vmem>>, vector<1x128x128xf32>
    %25 = vector.shape_cast %24 : vector<1x128x128xf32> to vector<128x128xf32>
    %26 = vector.shape_cast %23 : vector<128x128xf32> to vector<1x128x128xf32>
    tpu.vector_store %arg5[%c0_6, %c0_7, %c0_8], %26 {strides = array<i32>} : memref<1x128x128xf32, #tpu.memory_space<vmem>>, vector<1x128x128xf32>,
    return
  }
  func.func @transform_0(%arg0: i32, %arg1: i32) -> (i32, i32, i32, i32) {
    %c0_i32 = arith.constant 0 : i32
    %c0_i32_0 = arith.constant 0 : i32
    %c0_i32_1 = arith.constant 0 : i32
    %c0_i32_2 = arith.constant 0 : i32
    return %arg0, %c0_i32, %c0_i32_0, %c0_i32_1 : i32, i32, i32, i32
  }
  func.func @transform_1(%arg0: i32, %arg1: i32) -> (i32, i32) {
    %c0_i32 = arith.constant 0 : i32
    %c0_i32_0 = arith.constant 0 : i32
    %c0_i32_1 = arith.constant 0 : i32
    return %c0_i32, %c0_i32_0 : i32, i32
  }
  func.func @transform_2(%arg0: i32, %arg1: i32) -> (i32, i32) {
    %c0_i32 = arith.constant 0 : i32
    %c0_i32_0 = arith.constant 0 : i32
    %c0_i32_1 = arith.constant 0 : i32
    return %c0_i32, %c0_i32_0 : i32, i32
  }
  func.func @transform_3(%arg0: i32, %arg1: i32) -> (i32, i32, i32) {
    %c0_i32 = arith.constant 0 : i32
    %c0_i32_0 = arith.constant 0 : i32
    return %arg0, %arg1, %c0_i32 : i32, i32, i32
  }
}

</mosaic_0001>

<bundles_post_ra>
// kernel: tpu_custom_call.1
= control target key start
LH: loop header
LB: loop body
LE: loop exit
PB: predicated region body
PF: predicated region fallthrough
CT: control target
= control target key end

     0   :  { %8 = vsyncpa [#allocation3], 0  ;;  %s2307_s0 = inlined_call_operand.vmem [shape: f32[2,18,18,4], index: 0, kind: input, shape index: {}]   ;;  %s2308_s1 = inlined_call_operand.vmem [shape: f32[36,128], index: 1, kind: input, shape index: {}]   ;;  %s2309_s2 = inlined_call_operand.vmem [shape: f32[1,128], index: 2, kind: input, shape index: {}]   ;;  %s2310_s3 = inlined_call_operand.hbm [shape: f32[2,256,128], index: 3, kind: output, shape index: {}]  }
   0x1   :  { %10 = vsyncpa [#allocation3 + $0x1], 0  ;;  %s1498_s12 = smov 0   ;;  %s1500_s13 = smov 0  }
   0x2   :  { %s1502_s14 = smov 0   ;;  %s1504_s15 = smov 0  }
   0x3   :  { %s1506_s16 = smov 0   ;;  %s1508_s17 = smov 0  }
   0x4   :  { %s1510_s18 = smov 0   ;;  %s1512_s19 = smov 0  }
   0x5 LB: > { %s1189_s20 = sadd.s32 4294967295, %s1466_s19   ;;  %s1190_s21 = sadd.s32 4294967294, %s1466_s19   ;;  %s1466_s19 = sphi %s1512_s19, %s16_s19   ;;  %s1462_s18 = sphi %s1510_s18, %s2346_s18   ;;  %s1458_s17 = sphi %s1508_s17, %s2345_s17   ;;  %s1454_s16 = sphi %s1506_s16, %s2344_s16   ;;  %s1450_s15 = sphi %s1504_s15, %s2343_s15   ;;  %s1446_s14 = sphi %s1502_s14, %s2342_s14   ;;  %s1442_s13 = sphi %s1500_s13, %s2341_s13   ;;  %s1438_s12 = sphi %s1498_s12, %s2340_s12  }
   0x6   : > { %s25_s22 = sadd.s32 1, %s1458_s17  ;;  %s28_s23 = sadd.s32 1, %s1462_s18 }
   0x7   : > { %p26_p0 = scmp.ge.s32.totalorder %s25_s22, 2  ;;  %p115_p1 = scmp.ne.s32.totalorder %s1446_s14, %s1442_s13 }
   0x8   : > { %p116_p2 = scmp.eq.s32.totalorder %s1189_s20, 3  ;;  %p121_p5 = scmp.ne.s32.totalorder %s1442_s13, %s1438_s12 }
   0x9   : > { %s2348_s22 = smov (%p26_p0, %s25_s22), 0  ;;  %s2350_s23 = smov (!%p26_p0, %s28_s23), %s1462_s18 }
   0xa   : > { %s101_s24 = ssub.s32 %s1458_s17, %s2348_s22  ;;  %p1549_p3 = por %p116_p2, %p115_p1 }
   0xb   : > { %p30_p4 = scmp.ge.s32.totalorder %s2350_s23, 2  ;;  %p122_p6 = scmp.eq.s32.totalorder %s1190_s21, 3 }
   0xc   : > { %p1193_p7 = scmp.ge.s32.totalorder %s1466_s19, 1  ;;  %p154_p9 = scmp.lt.s32.totalorder %s1466_s19, 5 }
   0xd   : > { %s2352_s23 = smov (%p30_p4, %s2350_s23), 0  ;;  %p1558_p8 = por %p122_p6, %p121_p5 }
   0xe   : > { %s100_s27 = ssub.s32 %s1462_s18, %s2352_s23  ;;  %s105_s28 = sadd.s32 1, %s1446_s14 }
   0xf   : > { %s102_s29 = sor.u32 %s101_s24, %s100_s27  ;;  %p155_p10 = pnand %p1193_p7, %p154_p9 }
  0x10   : > { %p103_p11 = scmp.eq.s32.totalorder %s102_s29, 0 }
  0x11   : > { %158 = sbr.rel (%p155_p10) target bundleno = 635 (0x27b), region = 32 }
  0x12   : > { %s1567_s30 = scalar_select %p103_p11, %s1446_s14, %s105_s28  }
  0x18   : > { %p178_p12 = scmp.lt.s32.totalorder %s1454_s16, 1  ;;  %s1197_s5 = smul.u32 192, %s1450_s15  ;;  %vm241_vm0 = vcmask 1046528   ;;  %vm330_vm1 = vcmask 1045504   ;;  %vm930_vm2 = vcmask 1043456   ;;  %vm733_vm3 = vcmask 31744  }
  0x19   : > { %s1468_s11 = smov 4   ;;  %s1469_s20 = smov 8   ;;  %vm750_vm4 = vcmask 64512   ;;  %vm767_vm5 = vcmask 97280   ;;  %vm784_vm6 = vcmask 130048   ;;  %vm801_vm7 = vcmask 162816  }
  0x1a   : > { %s179_s4 = scalar_select %p178_p12, %s1454_s16, 1  ;;  %vm818_vm8 = vcmask 195584   ;;  %vm835_vm9 = vcmask 228352   ;;  %vm852_vm10 = vcmask 261120   ;;  %vm881_vm11 = vcmask 293888  }
  0x1b   : > { %s1470_s21 = smov 12   ;;  %s1471_s24 = smov 16  }
  0x1c   : > { %s1291_s6 = smul.u32 432, %s179_s4  ;;  %s1472_s27 = smov 20  }
  0x1d   : > { %s1473_s28 = smov 24   ;;  %s1474_s29 = smov 28  }
  0x1e   : > { %s182_s9 = scalar_lea.vmem %s2307_s0, %s1291_s6  ;;  %s1475_s6 = smov 32  }
  0x1f   : > { %s1575_s10 = scalar_lea.vmem %s182_s9, %s1197_s5 }
  0x20   : > { %v1578_v0 = vld [vmem:[%s1575_s10 + $0x8] sm:$0xff]  ;;  %v189_v1 = vld [vmem:[%s1575_s10 + $0x10] sm:$0x3]  ;;  %v1582_v2 = vld [vmem:[%s1575_s10] sm:$0xff] }
  0x21   : > { %v243_v3 = vrot.slane %v1578_v0, 1  ;;  %v245_v4 = vrot.slane %v189_v1, 1  ;;  %v242_v5 = vrot.slane %v1582_v2, 1  ;;  %v1587_v6 = vld [vmem:[%s1575_s10 + $0x68] sm:$0xff]  ;;  %v201_v7 = vld [vmem:[%s1575_s10 + $0x70] sm:$0x3] }
  0x22   : > { %v263_v8 = vrot.slane %v1587_v6, 1  ;;  %v265_v9 = vrot.slane %v201_v7, 1  ;;  %v1592_v10 = vld [vmem:[%s1575_s10 + $0x60] sm:$0xff]  ;;  %v352_v14 = vrot.slane %v1587_v6, 2  ;;  %v331_v15 = vrot.slane %v1582_v2, 2  ;;  %v1628_v26 = vld [vmem:[%s1575_s10 + $0x78] sm:$0xff] }
  0x23   : > { %v246_v11 = vsel %vm241_vm0, %v243_v3, %v245_v4  ;;  %v244_v12 = vsel %vm241_vm0, %v242_v5, %v243_v3  ;;  %v262_v13 = vrot.slane %v1592_v10, 1  ;;  %v351_v18 = vrot.slane %v1592_v10, 2  ;;  %v1631_v27 = vld [vmem:[%s1575_s10 + $0x18] sm:$0xff]  ;;  %v1634_v28 = vld [vmem:[%s1575_s10 + $0x80] sm:$0xff]  ;;  %v204_v36 = vld [vmem:[%s1575_s10 + $0x88] sm:$0x3] }
  0x24   : > { %284 = vrot.lane.b32.xlu1 %v246_v11, %s1468_s11  ;;  %282 = vrot.lane.b32.xlu0 %v244_v12, %s1468_s11  ;;  %v1602_v16 = vsel %vm241_vm0, %v263_v8, %v265_v9  ;;  %v332_v19 = vrot.slane %v1578_v0, 2  ;;  %v354_v22 = vrot.slane %v201_v7, 2  ;;  %v334_v23 = vrot.slane %v189_v1, 2  ;;  %v1637_v29 = vld [vmem:[%s1575_s10 + $0x20] sm:$0xff]  ;;  %v192_v37 = vld [vmem:[%s1575_s10 + $0x28] sm:$0x3] }
  0x25   : > { %v1605_v17 = vsel %vm241_vm0, %v262_v13, %v263_v8  ;;  %v1614_v20 = vsel %vm330_vm1, %v351_v18, %v352_v14  ;;  %v267_v30 = vrot.slane %v1628_v26, 1  ;;  %v268_v31 = vrot.slane %v1634_v28, 1  ;;  %v1695_v52 = vld [vmem:[%s1575_s10 + $0x90] sm:$0xff]  ;;  %v1708_v54 = vld [vmem:[%s1575_s10 + $0x98] sm:$0xff]  ;;  %v207_v62 = vld [vmem:[%s1575_s10 + $0xa0] sm:$0x3] }
  0x26   : > { %v333_v21 = vsel %vm330_vm1, %v331_v15, %v332_v19  ;;  %v1621_v24 = vsel %vm330_vm1, %v352_v14, %v354_v22  ;;  %v335_v25 = vsel %vm330_vm1, %v332_v19, %v334_v23  ;;  %v247_v32 = vrot.slane %v1631_v27, 1  ;;  %v1698_v53 = vld [vmem:[%s1575_s10 + $0x30] sm:$0xff]  ;;  %v1711_v55 = vld [vmem:[%s1575_s10 + $0x38] sm:$0xff]  ;;  %v195_v63 = vld [vmem:[%s1575_s10 + $0x40] sm:$0x3] }
  0x27   : > { %v248_v33 = vrot.slane %v1637_v29, 1  ;;  %v1652_v34 = vsel %vm241_vm0, %v267_v30, %v268_v31  ;;  %v270_v38 = vrot.slane %v204_v36, 1  ;;  %v250_v39 = vrot.slane %v192_v37, 1  ;;  %2326 = vst [vmem:[#allocation9_spill] sm:$0xff] %v1711_v55  ;;  %v869_v8 = vld [vmem:[%s2308_s1] sm:$0xff]  ;;  %v870_v9 = vld [vmem:[%s2308_s1 + $0x8] sm:$0xff] }
  0x28   : > { %300 = vrot.lane.b32.xlu1 %v1602_v16, %s1468_s11  ;;  %298 = vrot.lane.b32.xlu0 %v1605_v17, %s1468_s11  ;;  %2322 = vst [vmem:[#allocation5_spill] sm:$0xff] %v1652_v34  ;;  %v356_v40 = vrot.slane %v1628_v26, 2  ;;  %v357_v41 = vrot.slane %v1634_v28, 2  ;;  %v336_v44 = vrot.slane %v1631_v27, 2  ;;  %v337_v45 = vrot.slane %v1637_v29, 2  ;;  %v871_v15 = vld [vmem:[%s2308_s1 + $0x10] sm:$0xff] }
  0x29   : > { %v249_v35 = vsel %vm241_vm0, %v247_v32, %v248_v33  ;;  %v1666_v42 = vsel %vm241_vm0, %v268_v31, %v270_v38  ;;  %v251_v43 = vsel %vm241_vm0, %v248_v33, %v250_v39  ;;  %v359_v48 = vrot.slane %v204_v36, 2  ;;  %v872_v18 = vld [vmem:[%s2308_s1 + $0x18] sm:$0xff]  ;;  %v873_v23 = vld [vmem:[%s2308_s1 + $0x20] sm:$0xf]  ;;  %v1781_v33 = vld [vmem:[%s1575_s10 + $0xa8] sm:$0xff] }
  0x2a   : > { %2323 = vst [vmem:[#allocation6_spill] sm:$0xff] %v1666_v42  ;;  %v1675_v46 = vsel %vm330_vm1, %v356_v40, %v357_v41  ;;  %v338_v47 = vsel %vm330_vm1, %v336_v44, %v337_v45  ;;  %v339_v49 = vrot.slane %v192_v37, 2  ;;  %v272_v56 = vrot.slane %v1695_v52, 1  ;;  %2327 = vst [vmem:[#allocation10_spill] sm:$0xff] %v1781_v33  ;;  %v1808_v44 = vld [vmem:[%s1575_s10 + $0x50] sm:$0xff] }
  0x2b   : > { %2324 = vst [vmem:[#allocation7_spill] sm:$0xff] %v1675_v46  ;;  %v1688_v50 = vsel %vm330_vm1, %v357_v41, %v359_v48  ;;  %v273_v57 = vrot.slane %v1708_v54, 1  ;;  %v252_v58 = vrot.slane %v1698_v53, 1  ;;  %v253_v59 = vrot.slane %v1711_v55, 1  ;;  %2330 = vst [vmem:[#allocation13_spill] sm:$0xff] %v1808_v44 }
  0x2c   : > { %387 = vrot.lane.b32.xlu1 %v1614_v20, %s1469_s20  ;;  %371 = vrot.lane.b32.xlu0 %v333_v21, %s1469_s20  ;;  %2325 = vst [vmem:[#allocation8_spill] sm:$0xff] %v1688_v50  ;;  %v340_v51 = vsel %vm330_vm1, %v337_v45, %v339_v49  ;;  %v275_v1 = vrot.slane %v207_v62, 1  ;;  %v255_v3 = vrot.slane %v195_v63, 1  ;;  %v361_v4 = vrot.slane %v1695_v52, 2 }
  0x2d   : > { %v274_v60 = vsel %vm241_vm0, %v272_v56, %v273_v57  ;;  %v254_v61 = vsel %vm241_vm0, %v252_v58, %v253_v59  ;;  %v362_v5 = vrot.slane %v1708_v54, 2  ;;  %v341_v7 = vrot.slane %v1698_v53, 2 }
  0x2e   : > { %v276_v11 = vsel %vm241_vm0, %v273_v57, %v275_v1  ;;  %v256_v12 = vsel %vm241_vm0, %v253_v59, %v255_v3  ;;  %v342_v13 = vrot.slane %v1711_v55, 2  ;;  %v1277_v14 = vpack.c.bf16 %v870_v9, %v869_v8 }
  0x2f   : > { %v363_v19 = vsel %vm330_vm1, %v361_v4, %v362_v5  ;;  %v1281_v22 = vpack.c.bf16 %v872_v18, %v871_v15  ;;  %v344_v30 = vrot.slane %v195_v63, 2  ;;  %v277_v45 = vrot.slane %v1781_v33, 1 }
  0x30   : > { %389 = vrot.lane.b32.xlu1 %v1621_v24, %s1469_s20  ;;  %373 = vrot.lane.b32.xlu0 %v335_v25, %s1469_s20  ;;  %v343_v21 = vsel %vm330_vm1, %v341_v7, %v342_v13  ;;  %v364_v25 = vrot.slane %v207_v62, 2  ;;  %v258_v49 = vrot.slane %v1808_v44, 1  ;;  %v198_v62 = vld [vmem:[%s1575_s10 + $0x58] sm:$0x3] }
  0x31   : > { %1278 = vmatprep.subr.bf16.mxu0 %v1277_v14  ;;  %1285 = vmatprep.subr.bf16.mxu1 %v1277_v14  ;;  %v345_v32 = vsel %vm330_vm1, %v342_v13, %v344_v30  ;;  %v260_v4 = vrot.slane %v198_v62, 1 }
  0x32   : > { %1280 = vmatpush3.bf16.msra.mxu0 %v1277_v14  ;;  %1288 = vmatpush3.bf16.msra.mxu1 %v1277_v14  ;;  %v365_v31 = vsel %vm330_vm1, %v362_v5, %v364_v25  ;;  %v347_v14 = vrot.slane %v1808_v44, 2 }
  0x33   : > { %1282 = vmatprep.subr.bf16.mxu0 %v1281_v22  ;;  %1286 = vmatprep.subr.bf16.mxu1 %v1281_v22  ;;  %v261_v9 = vsel %vm241_vm0, %v258_v49, %v260_v4 }
  0x34   : > { %437 = vrot.lane.b32.xlu1 %v1628_v26, %s1470_s21  ;;  %421 = vrot.lane.b32.xlu0 %v1631_v27, %s1470_s21 }
  0x36   : > { %1284 = vmatpush3.bf16.msra.mxu0 %v1281_v22  ;;  %1289 = vmatpush3.bf16.msra.mxu1 %v1281_v22 }
  0x37   : > { %1251 = vmatprep.subr.msk.mxu0 %vm930_vm2, %v873_v23  ;;  %1287 = vmatprep.subr.msk.mxu1 %vm930_vm2, %v873_v23 }
  0x38   : > { %439 = vrot.lane.b32.xlu1 %v1634_v28, %s1470_s21  ;;  %423 = vrot.lane.b32.xlu0 %v1637_v29, %s1470_s21 }
  0x3a   : > { %1252 = vmatpush3.msk.msra.mxu0 %vm930_vm2, %v873_v23  ;;  %1290 = vmatpush3.msk.msra.mxu1 %vm930_vm2, %v873_v23 }
  0x3c   : > { %491 = vrot.lane.b32.xlu1 %v1652_v34, %s1471_s24  ;;  %475 = vrot.lane.b32.xlu0 %v249_v35, %s1471_s24 }
  0x40   : > { %302 = vrot.lane.b32.xlu1 %v1652_v34, %s1468_s11  ;;  %286 = vrot.lane.b32.xlu0 %v249_v35, %s1468_s11  ;;  %v1784_v35 = vld [vmem:[%s1575_s10 + $0x48] sm:$0xff] }
  0x41   : > { %2328 = vst [vmem:[#allocation11_spill] sm:$0xff] %v1784_v35  ;;  %v257_v48 = vrot.slane %v1784_v35, 1  ;;  %v346_v13 = vrot.slane %v1784_v35, 2 }
  0x43   : > { %v259_v58 = vsel %vm241_vm0, %v257_v48, %v258_v49 }
  0x44   : > { %493 = vrot.lane.b32.xlu1 %v1666_v42, %s1471_s24  ;;  %477 = vrot.lane.b32.xlu0 %v251_v43, %s1471_s24 }
  0x48   : > { %544 = vrot.lane.b32.xlu1 %v1675_v46, %s1472_s27  ;;  %528 = vrot.lane.b32.xlu0 %v338_v47, %s1472_s27 }
  0x4c   : > { %304 = vrot.lane.b32.xlu1 %v1666_v42, %s1468_s11  ;;  %288 = vrot.lane.b32.xlu0 %v251_v43, %s1468_s11  ;;  %v1805_v43 = vld [vmem:[%s1575_s10 + $0xb0] sm:$0xff] }
  0x4d   : > { %2329 = vst [vmem:[#allocation12_spill] sm:$0xff] %v1805_v43 }
  0x50   : > { %391 = vrot.lane.b32.xlu1 %v1675_v46, %s1469_s20  ;;  %375 = vrot.lane.b32.xlu0 %v338_v47, %s1469_s20  ;;  %v278_v47 = vrot.slane %v1805_v43, 1 }
  0x52   : > { %v279_v57 = vsel %vm241_vm0, %v277_v45, %v278_v47 }
  0x54   : > { %546 = vrot.lane.b32.xlu1 %v1688_v50, %s1472_s27  ;;  %530 = vrot.lane.b32.xlu0 %v340_v51, %s1472_s27 }
  0x58   : > { %594 = vrot.lane.b32.xlu1 %v1695_v52, %s1473_s28  ;;  %578 = vrot.lane.b32.xlu0 %v1698_v53, %s1473_s28 }
  0x5c   : > { %393 = vrot.lane.b32.xlu1 %v1688_v50, %s1469_s20  ;;  %377 = vrot.lane.b32.xlu0 %v340_v51, %s1469_s20 }
  0x60   : > { %441 = vrot.lane.b32.xlu1 %v1695_v52, %s1470_s21  ;;  %425 = vrot.lane.b32.xlu0 %v1698_v53, %s1470_s21 }
  0x64   : > { %596 = vrot.lane.b32.xlu1 %v1708_v54, %s1473_s28  ;;  %580 = vrot.lane.b32.xlu0 %v1711_v55, %s1473_s28 }
  0x68   : > { %648 = vrot.lane.b32.xlu1 %v274_v60, %s1474_s29  ;;  %632 = vrot.lane.b32.xlu0 %v254_v61, %s1474_s29 }
  0x6c   : > { %443 = vrot.lane.b32.xlu1 %v1708_v54, %s1470_s21  ;;  %427 = vrot.lane.b32.xlu0 %v1711_v55, %s1470_s21 }
  0x70   : > { %495 = vrot.lane.b32.xlu1 %v274_v60, %s1471_s24  ;;  %479 = vrot.lane.b32.xlu0 %v254_v61, %s1471_s24 }
  0x74   : > { %650 = vrot.lane.b32.xlu1 %v276_v11, %s1474_s29  ;;  %634 = vrot.lane.b32.xlu0 %v256_v12, %s1474_s29 }
  0x78   : > { %701 = vrot.lane.b32.xlu1 %v363_v19, %s1475_s6  ;;  %685 = vrot.lane.b32.xlu0 %v343_v21, %s1475_s6 }
  0x7c   : > { %306 = vrot.lane.b32.xlu1 %v274_v60, %s1468_s11  ;;  %290 = vrot.lane.b32.xlu0 %v254_v61, %s1468_s11  ;;  %v210_v61 = vld [vmem:[%s1575_s10 + $0xb8] sm:$0x3] }
  0x7d   : > { %v280_v3 = vrot.slane %v210_v61, 1  ;;  %v369_v45 = vrot.slane %v210_v61, 2 }
  0x7f   : > { %v281_v8 = vsel %vm241_vm0, %v278_v47, %v280_v3  ;;  %v349_v47 = vrot.slane %v198_v62, 2 }
  0x80   : > { %497 = vrot.lane.b32.xlu1 %v276_v11, %s1471_s24  ;;  %481 = vrot.lane.b32.xlu0 %v256_v12, %s1471_s24 }
  0x84   : > { %548 = vrot.lane.b32.xlu1 %v363_v19, %s1472_s27  ;;  %532 = vrot.lane.b32.xlu0 %v343_v21, %s1472_s27 }
  0x88   : > { %703 = vrot.lane.b32.xlu1 %v365_v31, %s1475_s6  ;;  %687 = vrot.lane.b32.xlu0 %v345_v32, %s1475_s6 }
  0x8c   : > { %308 = vrot.lane.b32.xlu1 %v276_v11, %s1468_s11  ;;  %292 = vrot.lane.b32.xlu0 %v256_v12, %s1468_s11  ;;  %v366_v11 = vrot.slane %v1781_v33, 2  ;;  %v367_v12 = vrot.slane %v1805_v43, 2 }
  0x90   : > { %395 = vrot.lane.b32.xlu1 %v363_v19, %s1469_s20  ;;  %379 = vrot.lane.b32.xlu0 %v343_v21, %s1469_s20  ;;  %v368_v19 = vsel %vm330_vm1, %v366_v11, %v367_v12  ;;  %v348_v21 = vsel %vm330_vm1, %v346_v13, %v347_v14 }
  0x94   : > { %550 = vrot.lane.b32.xlu1 %v365_v31, %s1472_s27  ;;  %534 = vrot.lane.b32.xlu0 %v345_v32, %s1472_s27 }
  0x96   : > { %v1786_v36 = vpop.permute.xlu1 %284  ;;  %v1788_v37 = vpop.permute.xlu0 %282 }
  0x98   : > { %598 = vrot.lane.b32.xlu1 %v1781_v33, %s1473_s28  ;;  %582 = vrot.lane.b32.xlu0 %v1784_v35, %s1473_s28 }
  0x9a   : > { %v1794_v38 = vpop.permute.xlu1 %300  ;;  %v1796_v39 = vpop.permute.xlu0 %298 }
  0x9c   : > { %397 = vrot.lane.b32.xlu1 %v365_v31, %s1469_s20  ;;  %381 = vrot.lane.b32.xlu0 %v345_v32, %s1469_s20 }
  0x9e   : > { %v1800_v40 = vpop.permute.xlu1 %387  ;;  %v1802_v41 = vpop.permute.xlu0 %371 }
  0xa0   : > { %445 = vrot.lane.b32.xlu1 %v1781_v33, %s1470_s21  ;;  %429 = vrot.lane.b32.xlu0 %v1784_v35, %s1470_s21 }
  0xa2   : > { %v1818_v51 = vpop.permute.xlu1 %389  ;;  %v1820_v56 = vpop.permute.xlu0 %373 }
  0xa4   : > { %600 = vrot.lane.b32.xlu1 %v1805_v43, %s1473_s28  ;;  %584 = vrot.lane.b32.xlu0 %v1808_v44, %s1473_s28 }
  0xa6   : > { %v1828_v59 = vpop.permute.xlu1 %437  ;;  %v1830_v60 = vpop.permute.xlu0 %421 }
  0xa8   : > { %652 = vrot.lane.b32.xlu1 %v279_v57, %s1474_s29  ;;  %636 = vrot.lane.b32.xlu0 %v259_v58, %s1474_s29 }
  0xaa   : > { %v1836_v63 = vpop.permute.xlu1 %439  ;;  %v1838_v1 = vpop.permute.xlu0 %423 }
  0xac   : > { %447 = vrot.lane.b32.xlu1 %v1805_v43, %s1470_s21  ;;  %431 = vrot.lane.b32.xlu0 %v1808_v44, %s1470_s21  ;;  %v1920_v43 = vld [vmem:[%s1575_s10 + $0xc8] sm:$0xff] }
  0xad   : > { %v471_v46 = vrot.slane %v1920_v43, 1 }
  0xae   : > { %v1844_v5 = vpop.permute.xlu1 %491  ;;  %v1846_v7 = vpop.permute.xlu0 %475 }
  0xb0   : > { %499 = vrot.lane.b32.xlu1 %v279_v57, %s1471_s24  ;;  %483 = vrot.lane.b32.xlu0 %v259_v58, %s1471_s24 }
  0xb2   : > { %v303_v15 = vpop.permute.xlu1 %302  ;;  %v287_v18 = vpop.permute.xlu0 %286 }
  0xb3   : > { %v744_v35 = vsel %vm733_vm3, %v1628_v26, %v303_v15  ;;  %v736_v33 = vsel %vm733_vm3, %v1631_v27, %v287_v18 }
  0xb4   : > { %654 = vrot.lane.b32.xlu1 %v281_v8, %s1474_s29  ;;  %638 = vrot.lane.b32.xlu0 %v261_v9, %s1474_s29 }
  0xb6   : > { %v1860_v22 = vpop.permute.xlu1 %493  ;;  %v1862_v23 = vpop.permute.xlu0 %477 }
  0xb8   : > { %705 = vrot.lane.b32.xlu1 %v368_v19, %s1475_s6  ;;  %689 = vrot.lane.b32.xlu0 %v348_v21, %s1475_s6 }
  0xba   : > { %v1866_v25 = vpop.permute.xlu1 %544  ;;  %v1868_v30 = vpop.permute.xlu0 %528 }
  0xbc   : > { %310 = vrot.lane.b32.xlu1 %v279_v57, %s1468_s11  ;;  %294 = vrot.lane.b32.xlu0 %v259_v58, %s1468_s11  ;;  %v370_v57 = vsel %vm330_vm1, %v367_v12, %v369_v45  ;;  %v350_v58 = vsel %vm330_vm1, %v347_v14, %v349_v47  ;;  %v1903_v45 = vld [vmem:[%s1575_s10 + $0xc0] sm:$0xff] }
  0xbd   : > { %v470_v50 = vrot.slane %v1903_v45, 1 }
  0xbe   : > { %v1872_v31 = vpop.permute.xlu1 %304  ;;  %v1874_v32 = vpop.permute.xlu0 %288 }
  0xc0   : > { %501 = vrot.lane.b32.xlu1 %v281_v8, %s1471_s24  ;;  %485 = vrot.lane.b32.xlu0 %v261_v9, %s1471_s24 }
  0xc2   : > { %v392_v48 = vpop.permute.xlu1 %391  ;;  %v376_v49 = vpop.permute.xlu0 %375 }
  0xc4   : > { %552 = vrot.lane.b32.xlu1 %v368_v19, %s1472_s27  ;;  %536 = vrot.lane.b32.xlu0 %v348_v21, %s1472_s27 }
  0xc6   : > { %v1882_v3 = vpop.permute.xlu1 %546  ;;  %v1884_v4 = vpop.permute.xlu0 %530 }
  0xc8   : > { %707 = vrot.lane.b32.xlu1 %v370_v57, %s1475_s6  ;;  %691 = vrot.lane.b32.xlu0 %v350_v58, %s1475_s6 }
  0xca   : > { %v1888_v61 = vpop.permute.xlu1 %594  ;;  %v1890_v62 = vpop.permute.xlu0 %578 }
  0xcc   : > { %312 = vrot.lane.b32.xlu1 %v281_v8, %s1468_s11  ;;  %296 = vrot.lane.b32.xlu0 %v261_v9, %s1468_s11 }
  0xce   : > { %v1894_v11 = vpop.permute.xlu1 %393  ;;  %v1896_v12 = vpop.permute.xlu0 %377 }
  0xd0   : > { %399 = vrot.lane.b32.xlu1 %v368_v19, %s1469_s20  ;;  %383 = vrot.lane.b32.xlu0 %v348_v21, %s1469_s20 }
  0xd2   : > { %v442_v13 = vpop.permute.xlu1 %441  ;;  %v426_v14 = vpop.permute.xlu0 %425 }
  0xd4   : > { %554 = vrot.lane.b32.xlu1 %v370_v57, %s1472_s27  ;;  %538 = vrot.lane.b32.xlu0 %v350_v58, %s1472_s27 }
  0xd6   : > { %v1905_v8 = vpop.permute.xlu1 %596  ;;  %v1907_v9 = vpop.permute.xlu0 %580 }
  0xd8   : > { %602 = vrot.lane.b32.xlu1 %v1903_v45, %s1473_s28  ;;  %586 = vrot.lane.b32.xlu0 %v1592_v10, %s1473_s28 }
  0xda   : > { %v649_v19 = vpop.permute.xlu1 %648  ;;  %v633_v21 = vpop.permute.xlu0 %632 }
  0xdc   : > { %401 = vrot.lane.b32.xlu1 %v370_v57, %s1469_s20  ;;  %385 = vrot.lane.b32.xlu0 %v350_v58, %s1469_s20  ;;  %v761_v57 = vsel %vm750_vm4, %v744_v35, %v392_v48  ;;  %v753_v58 = vsel %vm750_vm4, %v736_v33, %v376_v49  ;;  %v734_v33 = vsel %vm733_vm3, %v1582_v2, %v1788_v37 }
  0xdd   : > { %v778_v15 = vsel %vm767_vm5, %v761_v57, %v442_v13  ;;  %v770_v42 = vsel %vm767_vm5, %v753_v58, %v426_v14  ;;  %v742_v35 = vsel %vm733_vm3, %v1592_v10, %v1796_v39  ;;  %v472_v49 = vsel %vm241_vm0, %v470_v50, %v471_v46 }
  0xde   : > { %v1915_v47 = vpop.permute.xlu1 %443  ;;  %v1917_v44 = vpop.permute.xlu0 %427  ;;  %v759_v48 = vsel %vm750_vm4, %v742_v35, %v1800_v40  ;;  %v524_v35 = vrot.slane %v1920_v43, 2 }
  0xdf   : > { %v776_v2 = vsel %vm767_vm5, %v759_v48, %v1828_v59 }
  0xe0   : > { %449 = vrot.lane.b32.xlu1 %v1903_v45, %s1470_s21  ;;  %433 = vrot.lane.b32.xlu0 %v1592_v10, %s1470_s21  ;;  %v793_v13 = vsel %vm784_vm6, %v776_v2, %v1844_v5 }
  0xe1   : > { %v810_v50 = vsel %vm801_vm7, %v793_v13, %v1866_v25 }
  0xe2   : > { %v496_v27 = vpop.permute.xlu1 %495  ;;  %v480_v18 = vpop.permute.xlu0 %479  ;;  %v827_v59 = vsel %vm818_vm8, %v810_v50, %v1888_v61 }
  0xe3   : > { %v1937_v34 = vsel %vm784_vm6, %v778_v15, %v496_v27  ;;  %v1940_v55 = vsel %vm784_vm6, %v770_v42, %v480_v18  ;;  %v751_v42 = vsel %vm750_vm4, %v734_v33, %v1802_v41  ;;  %v844_v5 = vsel %vm835_vm9, %v827_v59, %v649_v19 }
  0xe4   : > { %604 = vrot.lane.b32.xlu1 %v1920_v43, %s1473_s28  ;;  %588 = vrot.lane.b32.xlu0 %v1587_v6, %s1473_s28  ;;  %v768_v10 = vsel %vm767_vm5, %v751_v42, %v1830_v60  ;;  %v737_v15 = vsel %vm733_vm3, %v1637_v29, %v1874_v32  ;;  %v523_v27 = vrot.slane %v1903_v45, 2 }
  0xe5   : > { %v785_v40 = vsel %vm784_vm6, %v768_v10, %v1846_v7  ;;  %v754_v33 = vsel %vm750_vm4, %v737_v15, %v1896_v12 }
  0xe6   : > { %v651_v37 = vpop.permute.xlu1 %650  ;;  %v635_v39 = vpop.permute.xlu0 %634  ;;  %v802_v41 = vsel %vm801_vm7, %v785_v40, %v1868_v30  ;;  %v213_v30 = vld [vmem:[%s1575_s10 + $0xd0] sm:$0x3]  ;;  %v771_v32 = vsel %vm767_vm5, %v754_v33, %v1917_v44 }
  0xe7   : > { %v819_v60 = vsel %vm818_vm8, %v802_v41, %v1890_v62  ;;  %v473_v61 = vrot.slane %v213_v30, 1 }
  0xe8   : > { %656 = vrot.lane.b32.xlu1 %v472_v49, %s1474_s29  ;;  %640 = vrot.lane.b32.xlu0 %v1605_v17, %s1474_s29  ;;  %v836_v7 = vsel %vm835_vm9, %v819_v60, %v633_v21  ;;  %v745_v21 = vsel %vm733_vm3, %v1634_v28, %v1872_v31 }
  0xe9   : > { %v762_v18 = vsel %vm750_vm4, %v745_v21, %v1894_v11  ;;  %v474_v31 = vsel %vm241_vm0, %v471_v46, %v473_v61  ;;  %v743_v46 = vsel %vm733_vm3, %v1587_v6, %v1794_v38 }
  0xea   : > { %v702_v25 = vpop.permute.xlu1 %701  ;;  %v686_v14 = vpop.permute.xlu0 %685  ;;  %v779_v29 = vsel %vm767_vm5, %v762_v18, %v1915_v47  ;;  %v525_v47 = vsel %vm330_vm1, %v523_v27, %v524_v35 }
  0xeb   : > { %v861_v57 = vsel %vm852_vm10, %v844_v5, %v702_v25  ;;  %v853_v58 = vsel %vm852_vm10, %v836_v7, %v686_v14  ;;  %v215_v7 = vld [vmem:[%s1575_s10 + $0xe0] sm:$0xff] }
  0xec   : > { %451 = vrot.lane.b32.xlu1 %v1920_v43, %s1470_s21  ;;  %1265 = vmatprep.mubr.msk.f32.mxu1 %vm881_vm11, %v861_v57  ;;  %v760_v43 = vsel %vm750_vm4, %v743_v46, %v1818_v51  ;;  %v628_v14 = vrot.slane %v215_v7, 1  ;;  %v2331_v57 = vld [vmem:[#allocation9_spill] sm:$0xff] }
  0xed   : > { %435 = vrot.lane.b32.xlu0 %v1587_v6, %s1470_s21  ;;  %1253 = vmatprep.mubr.msk.f32.mxu0 %vm881_vm11, %v853_v58 }
  0xee   : > { %v307_v62 = vpop.permute.xlu1 %306  ;;  %v291_v19 = vpop.permute.xlu0 %290 }
  0xef   : > { %v746_v13 = vsel %vm733_vm3, %v1695_v52, %v307_v62  ;;  %v214_v52 = vld [vmem:[%s1575_s10 + $0xd8] sm:$0xff] }
  0xf0   : > { %503 = vrot.lane.b32.xlu1 %v472_v49, %s1471_s24  ;;  %v627_v25 = vrot.slane %v214_v52, 1 }
  0xf1   : > { %487 = vrot.lane.b32.xlu0 %v1605_v17, %s1471_s24  ;;  %v735_v17 = vsel %vm733_vm3, %v1578_v0, %v1786_v36  ;;  %v777_v0 = vsel %vm767_vm5, %v760_v43, %v1836_v63 }
  0xf2   : > { %v498_v45 = vpop.permute.xlu1 %497  ;;  %v482_v48 = vpop.permute.xlu0 %481  ;;  %v752_v44 = vsel %vm750_vm4, %v735_v17, %v1820_v56  ;;  %v794_v51 = vsel %vm784_vm6, %v777_v0, %v1860_v22 }
  0xf3   : > { %v2008_v11 = vsel %vm784_vm6, %v779_v29, %v498_v45  ;;  %v2011_v12 = vsel %vm784_vm6, %v771_v32, %v482_v48  ;;  %v769_v36 = vsel %vm767_vm5, %v752_v44, %v1838_v1  ;;  %v811_v42 = vsel %vm801_vm7, %v794_v51, %v1882_v3  ;;  %v2332_v29 = vld [vmem:[#allocation5_spill] sm:$0xff]  ;;  %v2333_v48 = vld [vmem:[#allocation6_spill] sm:$0xff] }
  0xf4   : > { %658 = vrot.lane.b32.xlu1 %v474_v31, %s1474_s29  ;;  %v786_v56 = vsel %vm784_vm6, %v769_v36, %v1862_v23  ;;  %v828_v63 = vsel %vm818_vm8, %v811_v42, %v1905_v8  ;;  %v526_v8 = vrot.slane %v213_v30, 2 }
  0xf5   : > { %642 = vrot.lane.b32.xlu0 %v1602_v16, %s1474_s29  ;;  %v803_v49 = vsel %vm801_vm7, %v786_v56, %v1884_v4  ;;  %v845_v22 = vsel %vm835_vm9, %v828_v63, %v651_v37 }
  0xf6   : > { %v2031_v6 = vpop.permute.xlu1 %548  ;;  %v2033_v38 = vpop.permute.xlu0 %532  ;;  %v820_v1 = vsel %vm818_vm8, %v803_v49, %v1907_v9  ;;  %v2335_v49 = vld [vmem:[#allocation8_spill] sm:$0xff] }
  0xf7   : > { %v837_v23 = vsel %vm835_vm9, %v820_v1, %v635_v39  ;;  %v527_v39 = vsel %vm330_vm1, %v524_v35, %v526_v8  ;;  %v680_v35 = vrot.slane %v214_v52, 2 }
  0xf8   : > { %709 = vrot.lane.b32.xlu1 %v525_v47, %s1475_s6 }
  0xf9   : > { %693 = vrot.lane.b32.xlu0 %v1614_v20, %s1475_s6 }
  0xfa   : > { %v704_v2 = vpop.permute.xlu1 %703  ;;  %v688_v3 = vpop.permute.xlu0 %687 }
  0xfb   : > { %v862_v10 = vsel %vm852_vm10, %v845_v22, %v704_v2  ;;  %v854_v4 = vsel %vm852_vm10, %v837_v23, %v688_v3 }
  0xfc   : > { %505 = vrot.lane.b32.xlu1 %v474_v31, %s1471_s24  ;;  %1266 = vmatmul.mubr.msk.f32.vlgmr.msra.gmra.mrb[0].mxu1 %vm881_vm11, %v862_v10  ;;  %v681_v31 = vrot.slane %v215_v7, 2  ;;  %v812_v10 = vsel %vm801_vm7, %v1937_v34, %v2031_v6 }
  0xfd   : > { %489 = vrot.lane.b32.xlu0 %v1602_v16, %s1471_s24  ;;  %1254 = vmatmul.mubr.msk.f32.vlgmr.msra.gmra.mrb[0].mxu0 %vm881_vm11, %v854_v4  ;;  %v738_v16 = vsel %vm733_vm3, %v1698_v53, %v291_v19  ;;  %v804_v4 = vsel %vm801_vm7, %v1940_v55, %v2033_v38 }
  0xfe   : > { %v309_v9 = vpop.permute.xlu1 %308  ;;  %v293_v37 = vpop.permute.xlu0 %292  ;;  %v682_v17 = vsel %vm330_vm1, %v680_v35, %v681_v31 }
  0xff   : > { %v747_v30 = vsel %vm733_vm3, %v1708_v54, %v309_v9  ;;  %v739_v58 = vsel %vm733_vm3, %v2331_v57, %v293_v37 }
 0x100   : > { %556 = vrot.lane.b32.xlu1 %v525_v47, %s1472_s27  ;;  %v2334_v47 = vld [vmem:[#allocation7_spill] sm:$0xff] }
 0x101   : > { %540 = vrot.lane.b32.xlu0 %v1614_v20, %s1472_s27 }
 0x102   : > { %v396_v40 = vpop.permute.xlu1 %395  ;;  %v380_v50 = vpop.permute.xlu0 %379 }
 0x103   : > { %v763_v41 = vsel %vm750_vm4, %v746_v13, %v396_v40  ;;  %v755_v59 = vsel %vm750_vm4, %v738_v16, %v380_v50 }
 0x104   : > { %711 = vrot.lane.b32.xlu1 %v527_v39, %s1475_s6 }
 0x105   : > { %695 = vrot.lane.b32.xlu0 %v1621_v24, %s1475_s6 }
 0x106   : > { %v2072_v20 = vpop.permute.xlu1 %550  ;;  %v2074_v60 = vpop.permute.xlu0 %534 }
 0x108   : > { %558 = vrot.lane.b32.xlu1 %v527_v39, %s1472_s27 }
 0x109   : > { %542 = vrot.lane.b32.xlu0 %v1621_v24, %s1472_s27  ;;  %v216_v24 = vld [vmem:[%s1575_s10 + $0xe8] sm:$0x3]  ;;  %s175_s10 = sand.u32 1, %s1442_s13  }
 0x10a   : > { %v599_v53 = vpop.permute.xlu1 %598  ;;  %v583_v5 = vpop.permute.xlu0 %582  ;;  %v630_v15 = vrot.slane %v216_v24, 1  ;;  %v683_v46 = vrot.slane %v216_v24, 2  ;;  %s1194_s11 = sshll.u32 %s175_s10, 7 }
 0x10b   : > { %v829_v8 = vsel %vm818_vm8, %v812_v10, %v599_v53  ;;  %v821_v9 = vsel %vm818_vm8, %v804_v4, %v583_v5  ;;  %v813_v5 = vsel %vm801_vm7, %v2008_v11, %v2072_v20  ;;  %v2336_v20 = vld [vmem:[#allocation10_spill] sm:$0xff]  ;;  %s2224_s27 = scalar_lea.vmem [#allocation2], %s1194_s11  ;;  %s1476_s11 = smov [#allocation2]  }
 0x10c   : > { %606 = vrot.lane.b32.xlu1 %v214_v52, %s1473_s28  ;;  %v631_v32 = vsel %vm241_vm0, %v628_v14, %v630_v15  ;;  %v684_v0 = vsel %vm330_vm1, %v681_v31, %v683_v46  ;;  %s1111_s5 = sshll.u32 %s2224_s27, 4  ;;  %s1376_s21 = sshll.u32 %s1476_s11, 4  ;;  %s2247_s5 = int_to_ptr.vmem [resolvable:$true] %s1111_s5  ;;  %s1377_s21 = int_to_ptr.vmem [resolvable:$false] %s1376_s21 }
 0x10d   : > { %590 = vrot.lane.b32.xlu0 %v1628_v26, %s1473_s28  ;;  %v629_v26 = vsel %vm241_vm0, %v627_v25, %v628_v14  ;;  %s1372_s8 = scalar_lea.vmem %s2247_s5, 2048  ;;  %s1378_s24 = scalar_lea.vmem %s1377_s21, 4096 }
 0x10e   : > { %v398_v61 = vpop.permute.xlu1 %397  ;;  %v382_v62 = vpop.permute.xlu0 %381  ;;  %p1373_p13 = scmp.ne.s32.totalorder %s2247_s5, %s1372_s8  ;;  %p1379_p2 = scmp.lt.s32.totalorder %s2247_s5, %s1377_s21 }
 0x10f   : > { %v764_v19 = vsel %vm750_vm4, %v747_v30, %v398_v61  ;;  %v756_v21 = vsel %vm750_vm4, %v739_v58, %v382_v62  ;;  %p1380_p4 = scmp.lt.s32.totalorder %s1378_s24, %s1372_s8 }
 0x110   : > { %608 = vrot.lane.b32.xlu1 %v215_v7, %s1473_s28  ;;  %v805_v7 = vsel %vm801_vm7, %v2011_v12, %v2074_v60  ;;  %p1374_p0 = pnand %p1373_p13, %p1549_p3 }
 0x111   : > { %592 = vrot.lane.b32.xlu0 %v1634_v28, %s1473_s28  ;;  %s1217_s28 = sshll.u32 %s1450_s15, 4  ;;  %p1381_p5 = por %p1380_p4, %p1379_p2 }
 0x112   : > { %v446_v27 = vpop.permute.xlu1 %445  ;;  %v430_v54 = vpop.permute.xlu0 %429  ;;  %p1375_p1 = pneg %p1374_p0 }
 0x113   : > { %v780_v18 = vsel %vm767_vm5, %v763_v41, %v446_v27  ;;  %v772_v33 = vsel %vm767_vm5, %v755_v59, %v430_v54 }
 0x114   : > { %660 = vrot.lane.b32.xlu1 %v629_v26, %s1474_s29  ;;  %p1382_p6 = pnand %p1381_p5, %p1375_p1 }
 0x115   : > { %644 = vrot.lane.b32.xlu0 %v2332_v29, %s1474_s29 }
 0x116   : > { %v601_v45 = vpop.permute.xlu1 %600  ;;  %v585_v28 = vpop.permute.xlu0 %584 }
 0x117   : > { %v830_v25 = vsel %vm818_vm8, %v813_v5, %v601_v45  ;;  %v822_v14 = vsel %vm818_vm8, %v805_v7, %v585_v28 }
 0x118   : > { %662 = vrot.lane.b32.xlu1 %v631_v32, %s1474_s29 }
 0x119   : > { %646 = vrot.lane.b32.xlu0 %v2333_v48, %s1474_s29  ;;  %s1218_s29 = sshll.u32 %s1454_s16, 5  ;;  %s2254_s16 = scalar_lea.sflag [#allocation3], %s175_s10 }
 0x11a   : > { %v653_v43 = vpop.permute.xlu1 %652  ;;  %v637_v44 = vpop.permute.xlu0 %636  ;;  %s1108_s9 = sadd.s32 %s1218_s29, %s1217_s28 }
 0x11b   : > { %v846_v37 = vsel %vm835_vm9, %v829_v8, %v653_v43  ;;  %v838_v39 = vsel %vm835_vm9, %v821_v9, %v637_v44  ;;  %s1219_s4 = sshll.u32 %s1108_s9, 7 }
 0x11c   : > { %713 = vrot.lane.b32.xlu1 %v682_v17, %s1475_s6  ;;  %s2244_s15 = scalar_lea.hbm %s2310_s3, %s1219_s4 }
 0x11d   : > { %697 = vrot.lane.b32.xlu0 %v2334_v47, %s1475_s6 }
 0x11e   : > { %v448_v36 = vpop.permute.xlu1 %447  ;;  %v432_v51 = vpop.permute.xlu0 %431 }
 0x11f   : > { %v781_v56 = vsel %vm767_vm5, %v764_v19, %v448_v36  ;;  %v773_v42 = vsel %vm767_vm5, %v756_v21, %v432_v51  ;;  %v2337_v19 = vld [vmem:[#allocation11_spill] sm:$0xff] }
 0x120   : > { %715 = vrot.lane.b32.xlu1 %v684_v0, %s1475_s6 }
 0x121   : > { %699 = vrot.lane.b32.xlu0 %v2335_v49, %s1475_s6 }
 0x122   : > { %v500_v63 = vpop.permute.xlu1 %499  ;;  %v484_v1 = vpop.permute.xlu0 %483 }
 0x123   : > { %v2115_v22 = vsel %vm784_vm6, %v780_v18, %v500_v63  ;;  %v2118_v23 = vsel %vm784_vm6, %v772_v33, %v484_v1 }
 0x126   : > { %v655_v2 = vpop.permute.xlu1 %654  ;;  %v639_v3 = vpop.permute.xlu0 %638 }
 0x127   : > { %v847_v30 = vsel %vm835_vm9, %v830_v25, %v655_v2  ;;  %v839_v57 = vsel %vm835_vm9, %v822_v14, %v639_v3 }
 0x12a   : > { %v706_v13 = vpop.permute.xlu1 %705  ;;  %v690_v16 = vpop.permute.xlu0 %689 }
 0x12b   : > { %v863_v40 = vsel %vm852_vm10, %v846_v37, %v706_v13  ;;  %v855_v50 = vsel %vm852_vm10, %v838_v39, %v690_v16 }
 0x12c   : > { %1256 = vmatprep.mubr.msk.f32.mxu0 %vm881_vm11, %v855_v50  ;;  %1268 = vmatprep.mubr.msk.f32.mxu1 %vm881_vm11, %v863_v40 }
 0x12e   : > { %v311_v34 = vpop.permute.xlu1 %310  ;;  %v295_v55 = vpop.permute.xlu0 %294 }
 0x12f   : > { %v748_v60 = vsel %vm733_vm3, %v2336_v20, %v311_v34  ;;  %v740_v21 = vsel %vm733_vm3, %v2337_v19, %v295_v55 }
 0x132   : > { %v502_v6 = vpop.permute.xlu1 %501  ;;  %v486_v38 = vpop.permute.xlu0 %485 }
 0x133   : > { %v798_v41 = vsel %vm784_vm6, %v781_v56, %v502_v6  ;;  %v790_v59 = vsel %vm784_vm6, %v773_v42, %v486_v38 }
 0x136   : > { %v553_v52 = vpop.permute.xlu1 %552  ;;  %v537_v53 = vpop.permute.xlu0 %536 }
 0x137   : > { %v814_v42 = vsel %vm801_vm7, %v2115_v22, %v553_v52  ;;  %v806_v49 = vsel %vm801_vm7, %v2118_v23, %v537_v53 }
 0x13a   : > { %v708_v58 = vpop.permute.xlu1 %707  ;;  %v692_v61 = vpop.permute.xlu0 %691 }
 0x13b   : > { %v864_v62 = vsel %vm852_vm10, %v847_v30, %v708_v58  ;;  %v856_v24 = vsel %vm852_vm10, %v839_v57, %v692_v61 }
 0x13c   : > { %1257 = vmatmul.mubr.msk.f32.gmra.mrb[2].mxu0 %vm881_vm11, %v856_v24  ;;  %1269 = vmatmul.mubr.msk.f32.gmra.mrb[2].mxu1 %vm881_vm11, %v864_v62 }
 0x13e   : > { %v2150_v11 = vpop.permute.xlu1 %312  ;;  %v2152_v12 = vpop.permute.xlu0 %296 }
 0x142   : > { %v400_v26 = vpop.permute.xlu1 %399  ;;  %v384_v15 = vpop.permute.xlu0 %383 }
 0x143   : > { %v765_v27 = vsel %vm750_vm4, %v748_v60, %v400_v26  ;;  %v757_v54 = vsel %vm750_vm4, %v740_v21, %v384_v15  ;;  %v2338_v60 = vld [vmem:[#allocation12_spill] sm:$0xff]  ;;  %v2339_v15 = vld [vmem:[#allocation13_spill] sm:$0xff] }
 0x144   : > { %v749_v19 = vsel %vm733_vm3, %v2338_v60, %v2150_v11 }
 0x146   : > { %v555_v18 = vpop.permute.xlu1 %554  ;;  %v539_v33 = vpop.permute.xlu0 %538 }
 0x147   : > { %v815_v13 = vsel %vm801_vm7, %v798_v41, %v555_v18  ;;  %v807_v16 = vsel %vm801_vm7, %v790_v59, %v539_v33  ;;  %v741_v18 = vsel %vm733_vm3, %v2339_v15, %v2152_v12 }
 0x14a   : > { %v603_v35 = vpop.permute.xlu1 %602  ;;  %v587_v31 = vpop.permute.xlu0 %586 }
 0x14b   : > { %v831_v63 = vsel %vm818_vm8, %v814_v42, %v603_v35  ;;  %v823_v1 = vsel %vm818_vm8, %v806_v49, %v587_v31 }
 0x14e   : > { %v402_v29 = vpop.permute.xlu1 %401  ;;  %v386_v32 = vpop.permute.xlu0 %385 }
 0x14f   : > { %v758_v35 = vsel %vm750_vm4, %v741_v18, %v386_v32 }
 0x152   : > { %v450_v45 = vpop.permute.xlu1 %449  ;;  %v434_v28 = vpop.permute.xlu0 %433 }
 0x153   : > { %v782_v58 = vsel %vm767_vm5, %v765_v27, %v450_v45  ;;  %v774_v62 = vsel %vm767_vm5, %v757_v54, %v434_v28  ;;  %v766_v27 = vsel %vm750_vm4, %v749_v19, %v402_v29 }
 0x156   : > { %v605_v48 = vpop.permute.xlu1 %604  ;;  %v589_v17 = vpop.permute.xlu0 %588 }
 0x157   : > { %v832_v40 = vsel %vm818_vm8, %v815_v13, %v605_v48  ;;  %v824_v50 = vsel %vm818_vm8, %v807_v16, %v589_v17 }
 0x15a   : > { %v657_v46 = vpop.permute.xlu1 %656  ;;  %v641_v43 = vpop.permute.xlu0 %640 }
 0x15b   : > { %v848_v2 = vsel %vm835_vm9, %v831_v63, %v657_v46  ;;  %v840_v10 = vsel %vm835_vm9, %v823_v1, %v641_v43 }
 0x15e   : > { %v452_v44 = vpop.permute.xlu1 %451 }
 0x15f   : > { %v436_v47 = vpop.permute.xlu0 %435  ;;  %v783_v31 = vsel %vm767_vm5, %v766_v27, %v452_v44 }
 0x160   : > { %v775_v48 = vsel %vm767_vm5, %v758_v35, %v436_v47 }
 0x162   : > { %v504_v0 = vpop.permute.xlu1 %503 }
 0x163   : > { %v488_v36 = vpop.permute.xlu0 %487  ;;  %v799_v24 = vsel %vm784_vm6, %v782_v58, %v504_v0 }
 0x164   : > { %v791_v21 = vsel %vm784_vm6, %v774_v62, %v488_v36 }
 0x166   : > { %v659_v51 = vpop.permute.xlu1 %658 }
 0x167   : > { %v643_v56 = vpop.permute.xlu0 %642  ;;  %v849_v34 = vsel %vm835_vm9, %v832_v40, %v659_v51 }
 0x168   : > { %v841_v6 = vsel %vm835_vm9, %v824_v50, %v643_v56 }
 0x16a   : > { %v710_v3 = vpop.permute.xlu1 %709 }
 0x16b   : > { %v865_v4 = vsel %vm852_vm10, %v848_v2, %v710_v3  ;;  %v694_v8 = vpop.permute.xlu0 %693  ;;  %v1198_v2 = vld [vmem:[%s2309_s2] ss:$0 sm:$0xff] }
 0x16c   : > { %v857_v9 = vsel %vm852_vm10, %v840_v10, %v694_v8  ;;  %1271 = vmatprep.mubr.msk.f32.mxu1 %vm881_vm11, %v865_v4 }
 0x16d   : > { %1259 = vmatprep.mubr.msk.f32.mxu0 %vm881_vm11, %v857_v9 }
 0x16e   : > { %v506_v22 = vpop.permute.xlu1 %505 }
 0x16f   : > { %v490_v23 = vpop.permute.xlu0 %489  ;;  %v800_v17 = vsel %vm784_vm6, %v783_v31, %v506_v22 }
 0x170   : > { %v792_v43 = vsel %vm784_vm6, %v775_v48, %v490_v23 }
 0x172   : > { %v557_v37 = vpop.permute.xlu1 %556 }
 0x173   : > { %v541_v39 = vpop.permute.xlu0 %540  ;;  %v816_v26 = vsel %vm801_vm7, %v799_v24, %v557_v37 }
 0x174   : > { %v808_v33 = vsel %vm801_vm7, %v791_v21, %v541_v39 }
 0x176   : > { %v712_v55 = vpop.permute.xlu1 %711 }
 0x177   : > { %v866_v38 = vsel %vm852_vm10, %v849_v34, %v712_v55  ;;  %v696_v52 = vpop.permute.xlu0 %695 }
 0x178   : > { %v858_v53 = vsel %vm852_vm10, %v841_v6, %v696_v52  ;;  %1272 = vmatmul.mubr.msk.f32.gmra.mrb[4].mxu1 %vm881_vm11, %v866_v38 }
 0x179   : > { %1260 = vmatmul.mubr.msk.f32.gmra.mrb[4].mxu0 %vm881_vm11, %v858_v53 }
 0x17a   : > { %v559_v41 = vpop.permute.xlu1 %558 }
 0x17b   : > { %v543_v59 = vpop.permute.xlu0 %542  ;;  %v817_v32 = vsel %vm801_vm7, %v800_v17, %v559_v41 }
 0x17c   : > { %v809_v0 = vsel %vm801_vm7, %v792_v43, %v543_v59 }
 0x17e   : > { %v607_v5 = vpop.permute.xlu1 %606 }
 0x17f   : > { %v591_v7 = vpop.permute.xlu0 %590  ;;  %v833_v54 = vsel %vm818_vm8, %v816_v26, %v607_v5 }
 0x180   : > { %v825_v11 = vsel %vm818_vm8, %v808_v33, %v591_v7 }
 0x182   : > { %v609_v25 = vpop.permute.xlu1 %608 }
 0x183   : > { %v593_v14 = vpop.permute.xlu0 %592  ;;  %v834_v47 = vsel %vm818_vm8, %v817_v32, %v609_v25 }
 0x184   : > { %v826_v36 = vsel %vm818_vm8, %v809_v0, %v593_v14 }
 0x186   : > { %v661_v30 = vpop.permute.xlu1 %660 }
 0x187   : > { %v645_v57 = vpop.permute.xlu0 %644  ;;  %v850_v45 = vsel %vm835_vm9, %v833_v54, %v661_v30 }
 0x188   : > { %v842_v12 = vsel %vm835_vm9, %v825_v11, %v645_v57 }
 0x18a   : > { %v663_v61 = vpop.permute.xlu1 %662 }
 0x18b   : > { %v647_v20 = vpop.permute.xlu0 %646  ;;  %v851_v51 = vsel %vm835_vm9, %v834_v47, %v663_v61 }
 0x18c   : > { %v843_v42 = vsel %vm835_vm9, %v826_v36, %v647_v20 }
 0x18e   : > { %v714_v28 = vpop.permute.xlu1 %713 }
 0x18f   : > { %v867_v29 = vsel %vm852_vm10, %v850_v45, %v714_v28  ;;  %v698_v46 = vpop.permute.xlu0 %697 }
 0x190   : > { %v859_v44 = vsel %vm852_vm10, %v842_v12, %v698_v46  ;;  %1274 = vmatprep.mubr.msk.f32.mxu1 %vm881_vm11, %v867_v29 }
 0x191   : > { %1262 = vmatprep.mubr.msk.f32.mxu0 %vm881_vm11, %v859_v44 }
 0x192   : > { %v716_v56 = vpop.permute.xlu1 %715 }
 0x193   : > { %v868_v49 = vsel %vm852_vm10, %v851_v51, %v716_v56  ;;  %v700_v63 = vpop.permute.xlu0 %699 }
 0x194   : > { %v860_v1 = vsel %vm852_vm10, %v843_v42, %v700_v63  ;;  %1275 = vmatmul.mubr.msk.f32.gmra.mrb[6].mxu1 %vm881_vm11, %v868_v49 }
 0x195   : > { %1263 = vmatmul.mubr.msk.f32.gmra.mrb[6].mxu0 %vm881_vm11, %v860_v1 }
 0x1cf   : > { %v1267_v3 = vpop.f32.mrb[0].mxu1 }
 0x1d0   : > { %v1255_v10 = vpop.f32.mrb[0].mxu0  ;;  %v1046_v4 = vadd.f32 %v1267_v3, %v1198_v2  ;;  %v1040_v8 = vpop.f32.mrb[1].mxu1 }
 0x1d1   : > { %v1006_v9 = vadd.f32 %v1255_v10, %v1198_v2  ;;  %v1000_v22 = vpop.f32.mrb[1].mxu0  ;;  %v1041_v23 = vadd.f32 %v1198_v2, %v1040_v8 }
 0x1d2   : > { %1088 = vst [vmem:[%s2224_s27 + $0x48] sm:$0xff] %v1046_v4  ;;  %v1001_v37 = vadd.f32 %v1198_v2, %v1000_v22 }
 0x1d3   : > { %1080 = vst [vmem:[%s2224_s27 + $0x8] sm:$0xff] %v1006_v9  ;;  %1087 = vst [vmem:[%s2224_s27 + $0x40] sm:$0xff] %v1041_v23 }
 0x1d4   : > { %1079 = vst [vmem:[%s2224_s27] sm:$0xff] %v1001_v37 }
 0x20f   : > { %v1258_v39 = vpop.f32.mrb[2].mxu0  ;;  %v1270_v13 = vpop.f32.mrb[2].mxu1 }
 0x210   : > { %v1016_v16 = vadd.f32 %v1258_v39, %v1198_v2  ;;  %v1056_v40 = vadd.f32 %v1270_v13, %v1198_v2  ;;  %v1010_v50 = vpop.f32.mrb[3].mxu0  ;;  %v1050_v34 = vpop.f32.mrb[3].mxu1 }
 0x211   : > { %v1011_v55 = vadd.f32 %v1198_v2, %v1010_v50  ;;  %v1051_v6 = vadd.f32 %v1198_v2, %v1050_v34 }
 0x212   : > { %1082 = vst [vmem:[%s2224_s27 + $0x18] sm:$0xff] %v1016_v16  ;;  %1090 = vst [vmem:[%s2224_s27 + $0x58] sm:$0xff] %v1056_v40 }
 0x213   : > { %1081 = vst [vmem:[%s2224_s27 + $0x10] sm:$0xff] %v1011_v55  ;;  %1089 = vst [vmem:[%s2224_s27 + $0x50] sm:$0xff] %v1051_v6 }
 0x24b   : > { %v1273_v38 = vpop.f32.mrb[4].mxu1 }
 0x24c   : > { %v1261_v52 = vpop.f32.mrb[4].mxu0  ;;  %v1066_v53 = vadd.f32 %v1273_v38, %v1198_v2  ;;  %v1060_v41 = vpop.f32.mrb[5].mxu1 }
 0x24d   : > { %v1026_v59 = vadd.f32 %v1261_v52, %v1198_v2  ;;  %v1020_v5 = vpop.f32.mrb[5].mxu0  ;;  %v1061_v7 = vadd.f32 %v1198_v2, %v1060_v41 }
 0x24e   : > { %1092 = vst [vmem:[%s2224_s27 + $0x68] sm:$0xff] %v1066_v53  ;;  %v1021_v25 = vadd.f32 %v1198_v2, %v1020_v5 }
 0x24f   : > { %1084 = vst [vmem:[%s2224_s27 + $0x28] sm:$0xff] %v1026_v59  ;;  %1091 = vst [vmem:[%s2224_s27 + $0x60] sm:$0xff] %v1061_v7 }
 0x250   : > { %1083 = vst [vmem:[%s2224_s27 + $0x20] sm:$0xff] %v1021_v25 }
 0x267   : > { %v1276_v14 = vpop.f32.mrb[6].mxu1 }
 0x268   : > { %v1264_v30 = vpop.f32.mrb[6].mxu0  ;;  %v1076_v57 = vadd.f32 %v1276_v14, %v1198_v2  ;;  %v1070_v58 = vpop.f32.mrb[7].mxu1 }
 0x269   : > { %v1036_v61 = vadd.f32 %v1264_v30, %v1198_v2  ;;  %v1030_v62 = vpop.f32.mrb[7].mxu0  ;;  %v1071_v24 = vadd.f32 %v1198_v2, %v1070_v58 }
 0x26a   : > { %1094 = vst [vmem:[%s2224_s27 + $0x78] sm:$0xff] %v1076_v57  ;;  %v1031_v20 = vadd.f32 %v1198_v2, %v1030_v62 }
 0x26b   : > { %1086 = vst [vmem:[%s2224_s27 + $0x38] sm:$0xff] %v1036_v61  ;;  %1093 = vst [vmem:[%s2224_s27 + $0x70] sm:$0xff] %v1071_v24 }
 0x26c   : > { %1085 = vst [vmem:[%s2224_s27 + $0x30] sm:$0xff] %v1031_v20 }
 0x26d   : > { %1385 = shalt.err (!%p1382_p6)
}
 0x26e   : > { %s1386_s10 = scalar_lea.hbm %s2244_s15, 2048  ;;  %s1390_s29 = scalar_lea.hbm %s2310_s3, 8192 }
 0x26f   : > { %p1387_p7 = scmp.ne.s32.totalorder %s2244_s15, %s1386_s10  ;;  %p1391_p11 = scmp.lt.u32.totalorder %s2244_s15, %s2310_s3 }
 0x270   : > { %p1392_p12 = scmp.lt.u32.totalorder %s1390_s29, %s1386_s10  ;;  %p1394_p0 = scmp.lt.u32.totalorder %s1386_s10, %s2244_s15 }
 0x271   : > { %p1388_p9 = pnand %p1387_p7, %p1549_p3 }
 0x272   : > { %p1393_p13 = por %p1392_p12, %p1391_p11 }
 0x273   : > { %p1389_p10 = pneg %p1388_p9 }
 0x274   : > { %p1395_p1 = por %p1394_p0, %p1393_p13 }
 0x276   : > { %p1396_p2 = pnand %p1395_p1, %p1389_p10 }
 0x278   : > { %1399 = shalt.err (!%p1396_p2)
}
 0x279   : > { %s1477_s6 = smov 128  }
 0x27a   : > { %1292 = dma.vmem_to_hbm [thread:$0]  (%p1549_p3), %s2247_s5, 2048, %s2244_s15, %s2254_s16, %s1477_s6, %s1477_s6, %s1469_s20  }
 0x27b PF: > { %p1298_p4 = scmp.ge.s32.totalorder %s1466_s19, 2  ;;  %s1126_s7 = sand.u32 1, %s1438_s12  }
 0x27c   : > { %s1127_s8 = scalar_lea.sflag [#allocation3], %s1126_s7 }
 0x27d   : > { %p1295_p5 = pnand %p1298_p4, %p1558_p8 }
 0x27f   : > { %1433 = dma.done.wait (!%p1295_p5), %s1127_s8, 2048  }
 0x280   : > { %1435 = vsyncadd (!%p1295_p5), %s1127_s8, 4294965248  ;;  %s16_s19 = sadd.s32 1, %s1466_s19   ;;  %s2340_s12 = smov %s1442_s13 }
 0x281   : > { %p13_p6 = scmp.ge.s32.totalorder %s16_s19, 6   ;;  %s2341_s13 = smov %s1446_s14 }
 0x282   : > { %s2342_s14 = smov %s1567_s30  ;;  %s2343_s15 = smov %s1458_s17 }
 0x283   : > { %s2344_s16 = smov %s1462_s18  ;;  %s2345_s17 = smov %s2348_s22 }
 0x284   : > { %s2346_s18 = smov %s2352_s23  ;;  %15 = sbr.rel (!%p13_p6) target bundleno = 5 (0x5), region = 68 }
 0x28b   :  { %1132 = vsyncpa [#allocation3], 1 }
 0x28c   :  { %1134 = vsyncpa [#allocation3 + $0x1], 1 }

</bundles_post_ra>
